<compile_context>
chip_gen: v6e
topology: v6e:2x2x1
jax: 0.10.0
libtpu: 0.0.40
codegen_flags: <defaults>
</compile_context>

<pallas_src>
import numpy as np
import jax
import jax.numpy as jnp
from jax import lax
from jax.experimental import pallas as pl
from jax.experimental.pallas import tpu as pltpu


def _round_up(x, m):
    return ((x + m - 1) // m) * m


def _make_kernel(B, TB, NC, D, T, Bp, tlambda, cscale):
    """Island-loss kernel with all static shape / scale constants baked in."""
    T_f = float(T)
    has_pad = (Bp != B)

    def kernel(tlabel_ref, label_ref, feat_ref, centers_ref, out_ref,
               q_ref, acc_ref):
        p = pl.program_id(0)          # shard (parallel across TensorCores)
        j = pl.program_id(1)          # batch tile within the shard
        nj = pl.num_programs(1)

        # ---- one-time (per shard / core) setup at the first inner step -----
        @pl.when(j == 0)
        def _init():
            acc_ref[0] = 0.0          # running center-loss sum (unscaled)
            acc_ref[1] = 0.0          # running island sum (unscaled)
            centers = centers_ref[...]                                      # (NC, D) f32
            norm_sq = jnp.sum(centers * centers, axis=-1, keepdims=True)    # (NC, 1)
            # Guard rsqrt(0): a zero center row would otherwise emit inf/NaN
            # that the one-hot gathers could leak into valid rows.
            inv = jnp.where(norm_sq > 0.0, lax.rsqrt(norm_sq), 0.0)
            cn = centers * inv                                              # row-normalized
            cls = lax.broadcasted_iota(jnp.int32, (NC, T), 0)
            mask_ct = (cls == tlabel_ref[...]).astype(jnp.float32)          # (NC, T)
            counts = jnp.sum(mask_ct, axis=-1, keepdims=True)               # (NC, 1)
            s = jnp.sum(cn * counts, axis=0, keepdims=True)                 # (1, D) = sum_t cn[tlabel_t]
            dots = jnp.sum(cn * s, axis=-1, keepdims=True)                  # (NC, 1)
            q_ref[...] = dots + (T_f - 2.0 * counts)                        # per-class island scalar

        # ---- streamed per-tile hot loop -------------------------------------
        feat = feat_ref[...]
        if feat.dtype != jnp.float32:
            feat = feat.astype(jnp.float32)
        label = label_ref[...]                                              # (TB, 1) int32

        class_iota = lax.broadcasted_iota(jnp.int32, (TB, NC), 1)
        onehot = (class_iota == label).astype(jnp.float32)                  # (TB, NC)
        c_lab = jnp.dot(onehot, centers_ref[...],
                        preferred_element_type=jnp.float32)                 # (TB, D) MXU gather
        diff = feat - c_lab
        row_sq = jnp.sum(diff * diff, axis=-1, keepdims=True)               # (TB, 1)
        island_rows = jnp.dot(onehot, q_ref[...],
                              preferred_element_type=jnp.float32)           # (TB, 1)

        if has_pad:
            # Only traced at all when the batch was padded; jnp.where (not a
            # multiply mask) so padded-row NaN/Inf can never poison the sums.
            row0 = (p * nj + j) * TB
            rows = lax.broadcasted_iota(jnp.int32, (TB, 1), 0) + row0
            valid = rows < B
            row_sq = jnp.where(valid, row_sq, 0.0)
            island_rows = jnp.where(valid, island_rows, 0.0)

        acc_ref[0] = acc_ref[0] + jnp.sum(row_sq)
        acc_ref[1] = acc_ref[1] + jnp.sum(island_rows)

        # ---- per-shard epilogue (single lane-dense write) --------------------
        @pl.when(j == nj - 1)
        def _fin():
            total = tlambda * acc_ref[1] + cscale * acc_ref[0]
            out_ref[...] = jnp.full((1, 8, 128), total, dtype=jnp.float32)

    return kernel


def island_loss(label, feat, centers, tlabel, tlambda, size_average=True,
                tile_b=None, target_tile_bytes=4 << 20):
    """Pallas implementation of IsLandLoss.forward (returns a scalar float32)."""
    B = feat.shape[0]
    feat2 = feat.reshape(B, -1)
    D = feat2.shape[1]
    NC, Dc = centers.shape
    if D != Dc:
        raise ValueError("Center's dim: {0} should be equal to input feature's "
                         "dim: {1}".format(Dc, D))
    tlabel2 = tlabel.astype(jnp.int32).reshape(1, -1)
    T = int(tlabel2.shape[1])
    centers32 = centers.astype(jnp.float32)        # cast hoisted out of the kernel
    label2 = label.astype(jnp.int32).reshape(B, 1)

    fbytes = int(jnp.dtype(feat2.dtype).itemsize)
    D_pad = _round_up(D, 128)
    NC_pad = _round_up(NC, 8)
    T_pad = _round_up(T, 128)

    # Device-aware VMEM budget (~48 MiB on v7x's 64 MiB, ~96 MiB on v5e/v6e).
    try:
        cap = int(pltpu.get_tpu_info().vmem_capacity_bytes)
    except Exception:
        cap = 64 << 20                              # conservative: fits every gen
    budget = min((cap * 3) // 4, 96 << 20)

    def _vmem_need(tb, resident_bufs):
        need = resident_bufs * NC_pad * D_pad * 4   # centers (resident)
        need += resident_bufs * 8 * T_pad * 4       # tlabel (resident)
        need += 2 * tb * D_pad * fbytes             # feat tile, double buffered
        need += 2 * tb * 128 * 4                    # label tile (lane padded), double buffered
        need += tb * NC_pad * 4                     # onehot temporary
        need += 2 * tb * D_pad * 4                  # c_lab + diff temporaries
        if fbytes != 4:
            need += tb * D_pad * 4                  # f32 upcast of the feat tile
        need += NC_pad * D_pad * 4                  # cn (init-time temporary)
        need += NC_pad * T_pad * 4                  # class/target mask (init)
        need += NC_pad * 128 * 4                    # q scratch
        need += 2 << 20                             # margin (out tiles, small temps)
        return need

    # Batch tile: byte-targeted (~target_tile_bytes of feat per grid step),
    # clamped to the batch, multiple of 8, shrunk to fit the VMEM budget.
    if tile_b is None:
        tb = int(target_tile_bytes) // max(1, D_pad * fbytes)
    else:
        tb = int(tile_b)
    tb = min(tb, _round_up(B, 8))
    tb = max(8, (tb // 8) * 8)
    while tb > 8 and _vmem_need(tb, 1) > budget:
        tb = max(8, ((tb // 2) // 8) * 8)
    TB = tb

    ntiles = (B + TB - 1) // TB
    shards = 2 if ntiles >= 2 else 1               # split across TCs on v7x
    tiles_per_shard = (ntiles + shards - 1) // shards
    total_tiles = shards * tiles_per_shard
    Bp = total_tiles * TB

    if Bp != B:
        feat2 = jnp.pad(feat2, ((0, Bp - B), (0, 0)))
        label2 = jnp.pad(label2, ((0, Bp - B), (0, 0)))

    bs = float(B) if size_average else 1.0
    kernel = _make_kernel(B, TB, NC, D, T, Bp, float(tlambda), 0.5 / bs)

    # Scoped-VMEM limit budgeted for the worst case (double-buffered residents).
    vmem_limit = int(min(max(_vmem_need(TB, 2), 32 << 20), cap))

    def _run(single_buffer_resident):
        res_kw = {}
        if single_buffer_resident:
            res_kw = dict(pipeline_mode=pl.Buffered(1))
        grid_spec = pltpu.PrefetchScalarGridSpec(
            num_scalar_prefetch=0,
            grid=(shards, tiles_per_shard),
            in_specs=[
                pl.BlockSpec((1, T), lambda p, j: (0, 0), **res_kw),        # tlabel (resident)
                pl.BlockSpec((TB, 1),
                             lambda p, j: (p * tiles_per_shard + j, 0)),    # label tile
                pl.BlockSpec((TB, D),
                             lambda p, j: (p * tiles_per_shard + j, 0)),    # feat tile (streamed)
                pl.BlockSpec((NC, D), lambda p, j: (0, 0), **res_kw),       # centers (resident)
            ],
            out_specs=pl.BlockSpec((1, 8, 128), lambda p, j: (p, 0, 0)),
            scratch_shapes=[
                pltpu.VMEM((NC, 1), jnp.float32),   # per-class island scalar q_c
                pltpu.SMEM((2,), jnp.float32),      # [center_sum, island_sum]
            ],
        )
        out = pl.pallas_call(
            kernel,
            out_shape=jax.ShapeDtypeStruct((shards, 8, 128), jnp.float32),
            grid_spec=grid_spec,
            compiler_params=pltpu.CompilerParams(
                dimension_semantics=("parallel", "arbitrary"),
                vmem_limit_bytes=vmem_limit,
            ),
        )(tlabel2, label2, feat2, centers32)
        return jax.block_until_ready(out)

    try:
        out = _run(True)
    except Exception:
        # Fallback for JAX builds that reject BlockSpec(pipeline_mode=...):
        # default double-buffered resident blocks (slightly more VMEM).
        out = _run(False)

    return jnp.sum(out[:, 0, 0])


def _island_loss_ref(label, feat, centers, tlabel, tlambda, size_average=True):
    """Pure-numpy reference mirroring the PyTorch loops (f64 accumulation)."""
    feat = np.asarray(feat, dtype=np.float64).reshape(np.asarray(feat).shape[0], -1)
    centers = np.asarray(centers, dtype=np.float64)
    label = np.asarray(label).astype(np.int64)
    tlabel = np.asarray(tlabel).astype(np.int64).reshape(-1)
    B = feat.shape[0]
    bs = float(B) if size_average else 1.0
    centers_batch = centers[label]
    center_loss = np.sum((feat - centers_batch) ** 2) / 2.0 / bs
    island = 0.0
    for i in range(B):
        c_i = int(label[i])
        e1 = centers[c_i]
        n1 = np.linalg.norm(e1)
        for t in range(tlabel.shape[0]):
            if int(tlabel[t]) == c_i:
                continue
            e2 = centers[int(tlabel[t])]
            island += float(np.dot(e1, e2) / (n1 * np.linalg.norm(e2))) + 1.0
    return float(tlambda) * island + float(center_loss)


if __name__ == "__main__":
    def _check(batch, feat_dim, num_classes, tlambda, tile_b, seed, tag):
        key = jax.random.fold_in(jax.random.PRNGKey(0), seed)
        k_feat, k_centers, k_label = jax.random.split(key, 3)
        feat = jax.random.normal(k_feat, (batch, feat_dim), dtype=jnp.float32)
        centers = jax.random.normal(k_centers, (num_classes, feat_dim),
                                    dtype=jnp.float32)
        label = jax.random.randint(k_label, (batch,), 0, num_classes,
                                   dtype=jnp.int32)
        tlabel = jnp.arange(num_classes, dtype=jnp.int32)

        loss = island_loss(label, feat, centers, tlabel, tlambda,
                           size_average=True, tile_b=tile_b)
        loss = jax.block_until_ready(loss)

        ref = _island_loss_ref(np.asarray(label), np.asarray(feat),
                               np.asarray(centers), np.asarray(tlabel),
                               tlambda, size_average=True)
        assert np.allclose(float(loss), ref, rtol=2e-4, atol=2e-4), \
            (tag, float(loss), ref)

    # 1) tiny single-tile, single-shard case with batch padding (4 -> 8 rows).
    _check(batch=4, feat_dim=32, num_classes=8, tlambda=0.5, tile_b=None,
           seed=1, tag="small")
    # 2) multi-tile + 2-shard ("parallel" axis) accumulation with odd NC / T
    #    and batch padding (20 -> 4 tiles of 8 across 2 shards).
    _check(batch=20, feat_dim=48, num_classes=11, tlambda=0.3, tile_b=8,
           seed=2, tag="multitile")
    # 3) byte-targeted auto tile, exact-fit (no padding / no masking) path.
    _check(batch=64, feat_dim=256, num_classes=16, tlambda=0.7, tile_b=None,
           seed=3, tag="autotile")

    print("KERNEL_OK")
</pallas_src>

<mosaic_0001>
module attributes {stable_mosaic.version = 11 : i64} {
  func.func @kernel(%arg0: i32, %arg1: i32, %arg2: memref<1x8xi32, #tpu.memory_space<vmem>>, %arg3: memref<8x1xi32, #tpu.memory_space<vmem>>, %arg4: memref<8x32xf32, #tpu.memory_space<vmem>>, %arg5: memref<8x32xf32, #tpu.memory_space<vmem>>, %arg6: memref<1x8x128xf32, #tpu.memory_space<vmem>>, %arg7: memref<8x1xf32, #tpu.memory_space<vmem>>, %arg8: memref<2xf32, #tpu.memory_space<smem>>) attributes {dimension_semantics = [#tpu.dimension_semantics<parallel>, #tpu.dimension_semantics<arbitrary>], iteration_bounds = array<i64: 1, 1>, scalar_prefetch = 0 : i64, scratch_operands = 2 : i64, tpu.core_type = #tpu.core_type<tc>, window_params = [{pipeline_mode = #tpu.pipeline_mode<synchronous>, transform_indices = @transform_0, window_bounds = array<i64: 1, 8>}, {transform_indices = @transform_1, window_bounds = array<i64: 8, 1>}, {transform_indices = @transform_2, window_bounds = array<i64: 8, 32>}, {pipeline_mode = #tpu.pipeline_mode<synchronous>, transform_indices = @transform_3, window_bounds = array<i64: 8, 32>}, {transform_indices = @transform_4, window_bounds = array<i64: 1, 8, 128>}]} {
    %c0_i32 = arith.constant 0 : i32
    %0 = arith.cmpi eq, %arg1, %c0_i32 : i32
    %1 = arith.extui %0 : i1 to i32
    %c0_i32_0 = arith.constant 0 : i32
    %2 = arith.cmpi ne, %1, %c0_i32_0 : i32
    scf.if %2 {
      %cst_19 = arith.constant 0.000000e+00 : f32
      %c0_20 = arith.constant 0 : index
      %47 = memref.load %arg8[%c0_20] : memref<2xf32, #tpu.memory_space<smem>>
      memref.store %cst_19, %arg8[%c0_20] : memref<2xf32, #tpu.memory_space<smem>>
      %cst_21 = arith.constant 0.000000e+00 : f32
      %c1_22 = arith.constant 1 : index
      %48 = memref.load %arg8[%c1_22] : memref<2xf32, #tpu.memory_space<smem>>
      memref.store %cst_21, %arg8[%c1_22] : memref<2xf32, #tpu.memory_space<smem>>
      %c0_23 = arith.constant 0 : index
      %c0_24 = arith.constant 0 : index
      %49 = vector.load %arg5[%c0_23, %c0_24] : memref<8x32xf32, #tpu.memory_space<vmem>>, vector<8x32xf32>
      %50 = arith.mulf %49, %49 : vector<8x32xf32>
      %cst_25 = arith.constant dense<0.000000e+00> : vector<8xf32>
      %51 = vector.multi_reduction <add>, %50, %cst_25 [1] : vector<8x32xf32> to vector<8xf32>
      %52 = vector.shape_cast %51 : vector<8xf32> to vector<8x1xf32>
      %cst_26 = arith.constant 0.000000e+00 : f32
      %53 = vector.broadcast %cst_26 : f32 to vector<8x1xf32>
      %54 = arith.cmpf ogt, %52, %53 : vector<8x1xf32>
      %55 = math.rsqrt %52 : vector<8x1xf32>
      %cst_27 = arith.constant 0.000000e+00 : f32
      %56 = vector.broadcast %cst_27 : f32 to vector<8x1xf32>
      %57 = arith.select %54, %55, %56 : vector<8x1xi1>, vector<8x1xf32>
      %58 = vector.broadcast %57 : vector<8x1xf32> to vector<8x32xf32>
      %59 = arith.mulf %49, %58 : vector<8x32xf32>
      %60 = tpu.iota {dimensions = array<i32: 0>} : vector<8x8xi32>
      %c0_28 = arith.constant 0 : index
      %c0_29 = arith.constant 0 : index
      %61 = vector.load %arg2[%c0_28, %c0_29] : memref<1x8xi32, #tpu.memory_space<vmem>>, vector<1x8xi32>
      %62 = vector.broadcast %61 : vector<1x8xi32> to vector<8x8xi32>
      %63 = arith.cmpi eq, %60, %62 : vector<8x8xi32>
      %64 = arith.extui %63 : vector<8x8xi1> to vector<8x8xi32>
      %65 = arith.sitofp %64 : vector<8x8xi32> to vector<8x8xf32>
      %cst_30 = arith.constant dense<0.000000e+00> : vector<8xf32>
      %66 = vector.multi_reduction <add>, %65, %cst_30 [1] : vector<8x8xf32> to vector<8xf32>
      %67 = vector.shape_cast %66 : vector<8xf32> to vector<8x1xf32>
      %68 = vector.broadcast %67 : vector<8x1xf32> to vector<8x32xf32>
      %69 = arith.mulf %59, %68 : vector<8x32xf32>
      %cst_31 = arith.constant dense<0.000000e+00> : vector<32xf32>
      %70 = vector.multi_reduction <add>, %69, %cst_31 [0] : vector<8x32xf32> to vector<32xf32>
      %71 = vector.shape_cast %70 : vector<32xf32> to vector<1x32xf32>
      %72 = vector.broadcast %71 : vector<1x32xf32> to vector<8x32xf32>
      %73 = arith.mulf %59, %72 : vector<8x32xf32>
      %cst_32 = arith.constant dense<0.000000e+00> : vector<8xf32>
      %74 = vector.multi_reduction <add>, %73, %cst_32 [1] : vector<8x32xf32> to vector<8xf32>
      %75 = vector.shape_cast %74 : vector<8xf32> to vector<8x1xf32>
      %cst_33 = arith.constant 2.000000e+00 : f32
      %76 = vector.broadcast %cst_33 : f32 to vector<8x1xf32>
      %77 = arith.mulf %76, %67 : vector<8x1xf32>
      %cst_34 = arith.constant 8.000000e+00 : f32
      %78 = vector.broadcast %cst_34 : f32 to vector<8x1xf32>
      %79 = arith.subf %78, %77 : vector<8x1xf32>
      %80 = arith.addf %75, %79 : vector<8x1xf32>
      %c0_35 = arith.constant 0 : index
      %c0_36 = arith.constant 0 : index
      %81 = vector.load %arg7[%c0_35, %c0_36] : memref<8x1xf32, #tpu.memory_space<vmem>>, vector<8x1xf32>
      tpu.vector_store %arg7[%c0_35, %c0_36], %80 {strides = array<i32>} : memref<8x1xf32, #tpu.memory_space<vmem>>, vector<8x1xf32>,
    } else {
    }
    %c0 = arith.constant 0 : index
    %c0_1 = arith.constant 0 : index
    %3 = vector.load %arg4[%c0, %c0_1] : memref<8x32xf32, #tpu.memory_space<vmem>>, vector<8x32xf32>
    %c0_2 = arith.constant 0 : index
    %c0_3 = arith.constant 0 : index
    %4 = vector.load %arg3[%c0_2, %c0_3] : memref<8x1xi32, #tpu.memory_space<vmem>>, vector<8x1xi32>
    %5 = tpu.iota {dimensions = array<i32: 1>} : vector<8x8xi32>
    %6 = vector.broadcast %4 : vector<8x1xi32> to vector<8x8xi32>
    %7 = arith.cmpi eq, %5, %6 : vector<8x8xi32>
    %8 = arith.extui %7 : vector<8x8xi1> to vector<8x8xi32>
    %9 = arith.sitofp %8 : vector<8x8xi32> to vector<8x8xf32>
    %c0_4 = arith.constant 0 : index
    %c0_5 = arith.constant 0 : index
    %10 = vector.load %arg5[%c0_4, %c0_5] : memref<8x32xf32, #tpu.memory_space<vmem>>, vector<8x32xf32>
    %cst = arith.constant dense<0.000000e+00> : vector<8x32xf32>
    %11 = tpu.matmul %9, %10, %cst {dimension_numbers = #tpu.dot_dimension_numbers<[1], [0], [0], [1], [0, 0, 1, 1], [], []>} : vector<8x8xf32>, vector<8x32xf32>, vector<8x32xf32> -> vector<8x32xf32>
    %12 = arith.subf %3, %11 : vector<8x32xf32>
    %13 = arith.mulf %12, %12 : vector<8x32xf32>
    %cst_6 = arith.constant dense<0.000000e+00> : vector<8xf32>
    %14 = vector.multi_reduction <add>, %13, %cst_6 [1] : vector<8x32xf32> to vector<8xf32>
    %15 = vector.shape_cast %14 : vector<8xf32> to vector<8x1xf32>
    %c0_7 = arith.constant 0 : index
    %c0_8 = arith.constant 0 : index
    %16 = vector.load %arg7[%c0_7, %c0_8] : memref<8x1xf32, #tpu.memory_space<vmem>>, vector<8x1xf32>
    %cst_9 = arith.constant dense<0.000000e+00> : vector<8x1xf32>
    %17 = tpu.matmul %9, %16, %cst_9 {dimension_numbers = #tpu.dot_dimension_numbers<[1], [0], [0], [1], [0, 0, 1, 1], [], []>} : vector<8x8xf32>, vector<8x1xf32>, vector<8x1xf32> -> vector<8x1xf32>
    %c1_i32 = arith.constant 1 : i32
    %18 = arith.muli %arg0, %c1_i32 : i32
    %19 = arith.addi %18, %arg1 : i32
    %c8_i32 = arith.constant 8 : i32
    %20 = arith.muli %19, %c8_i32 : i32
    %21 = tpu.iota {dimensions = array<i32: 0>} : vector<8x1xi32>
    %22 = vector.broadcast %20 : i32 to vector<8x1xi32>
    %23 = arith.addi %21, %22 : vector<8x1xi32>
    %c4_i32 = arith.constant 4 : i32
    %24 = vector.broadcast %c4_i32 : i32 to vector<8x1xi32>
    %25 = arith.cmpi slt, %23, %24 : vector<8x1xi32>
    %cst_10 = arith.constant 0.000000e+00 : f32
    %26 = vector.broadcast %cst_10 : f32 to vector<8x1xf32>
    %27 = arith.select %25, %15, %26 : vector<8x1xi1>, vector<8x1xf32>
    %cst_11 = arith.constant 0.000000e+00 : f32
    %28 = vector.broadcast %cst_11 : f32 to vector<8x1xf32>
    %29 = arith.select %25, %17, %28 : vector<8x1xi1>, vector<8x1xf32>
    %c0_12 = arith.constant 0 : index
    %30 = memref.load %arg8[%c0_12] : memref<2xf32, #tpu.memory_space<smem>>
    %31 = vector.shape_cast %27 : vector<8x1xf32> to vector<1x8x1xf32>
    %cst_13 = arith.constant dense<0.000000e+00> : vector<1xf32>
    %32 = vector.multi_reduction <add>, %31, %cst_13 [1, 2] : vector<1x8x1xf32> to vector<1xf32>
    %33 = vector.shape_cast %32 : vector<1xf32> to vector<1x1x1xf32>
    %34 = vector.extract %33[0, 0, 0] : f32 from vector<1x1x1xf32>
    %35 = arith.addf %30, %34 : f32
    %c0_14 = arith.constant 0 : index
    %36 = memref.load %arg8[%c0_14] : memref<2xf32, #tpu.memory_space<smem>>
    memref.store %35, %arg8[%c0_14] : memref<2xf32, #tpu.memory_space<smem>>
    %c1 = arith.constant 1 : index
    %37 = memref.load %arg8[%c1] : memref<2xf32, #tpu.memory_space<smem>>
    %38 = vector.shape_cast %29 : vector<8x1xf32> to vector<1x8x1xf32>
    %cst_15 = arith.constant dense<0.000000e+00> : vector<1xf32>
    %39 = vector.multi_reduction <add>, %38, %cst_15 [1, 2] : vector<1x8x1xf32> to vector<1xf32>
    %40 = vector.shape_cast %39 : vector<1xf32> to vector<1x1x1xf32>
    %41 = vector.extract %40[0, 0, 0] : f32 from vector<1x1x1xf32>
    %42 = arith.addf %37, %41 : f32
    %c1_16 = arith.constant 1 : index
    %43 = memref.load %arg8[%c1_16] : memref<2xf32, #tpu.memory_space<smem>>
    memref.store %42, %arg8[%c1_16] : memref<2xf32, #tpu.memory_space<smem>>
    %c0_i32_17 = arith.constant 0 : i32
    %44 = arith.cmpi eq, %arg1, %c0_i32_17 : i32
    %45 = arith.extui %44 : i1 to i32
    %c0_i32_18 = arith.constant 0 : i32
    %46 = arith.cmpi ne, %45, %c0_i32_18 : i32
    scf.if %46 {
      %c1_19 = arith.constant 1 : index
      %47 = memref.load %arg8[%c1_19] : memref<2xf32, #tpu.memory_space<smem>>
      %cst_20 = arith.constant 5.000000e-01 : f32
      %48 = arith.mulf %cst_20, %47 : f32
      %c0_21 = arith.constant 0 : index
      %49 = memref.load %arg8[%c0_21] : memref<2xf32, #tpu.memory_space<smem>>
      %cst_22 = arith.constant 1.250000e-01 : f32
      %50 = arith.mulf %cst_22, %49 : f32
      %51 = arith.addf %48, %50 : f32
      %52 = vector.broadcast %51 : f32 to vector<1x8x128xf32>
      %c0_23 = arith.constant 0 : index
      %c0_24 = arith.constant 0 : index
      %c0_25 = arith.constant 0 : index
      %53 = vector.load %arg6[%c0_23, %c0_24, %c0_25] : memref<1x8x128xf32, #tpu.memory_space<vmem>>, vector<1x8x128xf32>
      tpu.vector_store %arg6[%c0_23, %c0_24, %c0_25], %52 {strides = array<i32>} : memref<1x8x128xf32, #tpu.memory_space<vmem>>, vector<1x8x128xf32>,
    } else {
    }
    return
  }
  func.func @transform_0(%arg0: i32, %arg1: i32) -> (i32, i32) {
    %c0_i32 = arith.constant 0 : i32
    %c0_i32_0 = arith.constant 0 : i32
    %c0_i32_1 = arith.constant 0 : i32
    return %c0_i32, %c0_i32_0 : i32, i32
  }
  func.func @transform_1(%arg0: i32, %arg1: i32) -> (i32, i32) {
    %c1_i32 = arith.constant 1 : i32
    %0 = arith.muli %arg0, %c1_i32 : i32
    %1 = arith.addi %0, %arg1 : i32
    %c0_i32 = arith.constant 0 : i32
    %c0_i32_0 = arith.constant 0 : i32
    return %1, %c0_i32 : i32, i32
  }
  func.func @transform_2(%arg0: i32, %arg1: i32) -> (i32, i32) {
    %c1_i32 = arith.constant 1 : i32
    %0 = arith.muli %arg0, %c1_i32 : i32
    %1 = arith.addi %0, %arg1 : i32
    %c0_i32 = arith.constant 0 : i32
    %c0_i32_0 = arith.constant 0 : i32
    return %1, %c0_i32 : i32, i32
  }
  func.func @transform_3(%arg0: i32, %arg1: i32) -> (i32, i32) {
    %c0_i32 = arith.constant 0 : i32
    %c0_i32_0 = arith.constant 0 : i32
    %c0_i32_1 = arith.constant 0 : i32
    return %c0_i32, %c0_i32_0 : i32, i32
  }
  func.func @transform_4(%arg0: i32, %arg1: i32) -> (i32, i32, i32) {
    %c0_i32 = arith.constant 0 : i32
    %c0_i32_0 = arith.constant 0 : i32
    %c0_i32_1 = arith.constant 0 : i32
    return %arg0, %c0_i32, %c0_i32_0 : i32, i32, i32
  }
}

module attributes {stable_mosaic.version = 11 : i64} {
  func.func @kernel(%arg0: i32, %arg1: i32, %arg2: memref<1x8xi32, #tpu.memory_space<vmem>>, %arg3: memref<8x1xi32, #tpu.memory_space<vmem>>, %arg4: memref<8x32xf32, #tpu.memory_space<vmem>>, %arg5: memref<8x32xf32, #tpu.memory_space<vmem>>, %arg6: memref<1x8x128xf32, #tpu.memory_space<vmem>>, %arg7: memref<8x1xf32, #tpu.memory_space<vmem>>, %arg8: memref<2xf32, #tpu.memory_space<smem>>) attributes {dimension_semantics = [#tpu.dimension_semantics<parallel>, #tpu.dimension_semantics<arbitrary>], iteration_bounds = array<i64: 1, 1>, scalar_prefetch = 0 : i64, scratch_operands = 2 : i64, tpu.core_type = #tpu.core_type<tc>, window_params = [{pipeline_mode = #tpu.pipeline_mode<synchronous>, transform_indices = @transform_0, window_bounds = array<i64: 1, 8>}, {transform_indices = @transform_1, window_bounds = array<i64: 8, 1>}, {transform_indices = @transform_2, window_bounds = array<i64: 8, 32>}, {pipeline_mode = #tpu.pipeline_mode<synchronous>, transform_indices = @transform_3, window_bounds = array<i64: 8, 32>}, {transform_indices = @transform_4, window_bounds = array<i64: 1, 8, 128>}]} {
    %c0_i32 = arith.constant 0 : i32
    %0 = arith.cmpi eq, %arg1, %c0_i32 : i32
    %1 = arith.extui %0 : i1 to i32
    %c0_i32_0 = arith.constant 0 : i32
    %2 = arith.cmpi ne, %1, %c0_i32_0 : i32
    scf.if %2 {
      %cst_19 = arith.constant 0.000000e+00 : f32
      %c0_20 = arith.constant 0 : index
      %47 = memref.load %arg8[%c0_20] : memref<2xf32, #tpu.memory_space<smem>>
      memref.store %cst_19, %arg8[%c0_20] : memref<2xf32, #tpu.memory_space<smem>>
      %cst_21 = arith.constant 0.000000e+00 : f32
      %c1_22 = arith.constant 1 : index
      %48 = memref.load %arg8[%c1_22] : memref<2xf32, #tpu.memory_space<smem>>
      memref.store %cst_21, %arg8[%c1_22] : memref<2xf32, #tpu.memory_space<smem>>
      %c0_23 = arith.constant 0 : index
      %c0_24 = arith.constant 0 : index
      %49 = vector.load %arg5[%c0_23, %c0_24] : memref<8x32xf32, #tpu.memory_space<vmem>>, vector<8x32xf32>
      %50 = arith.mulf %49, %49 : vector<8x32xf32>
      %cst_25 = arith.constant dense<0.000000e+00> : vector<8xf32>
      %51 = vector.multi_reduction <add>, %50, %cst_25 [1] : vector<8x32xf32> to vector<8xf32>
      %52 = vector.shape_cast %51 : vector<8xf32> to vector<8x1xf32>
      %cst_26 = arith.constant 0.000000e+00 : f32
      %53 = vector.broadcast %cst_26 : f32 to vector<8x1xf32>
      %54 = arith.cmpf ogt, %52, %53 : vector<8x1xf32>
      %55 = math.rsqrt %52 : vector<8x1xf32>
      %cst_27 = arith.constant 0.000000e+00 : f32
      %56 = vector.broadcast %cst_27 : f32 to vector<8x1xf32>
      %57 = arith.select %54, %55, %56 : vector<8x1xi1>, vector<8x1xf32>
      %58 = vector.broadcast %57 : vector<8x1xf32> to vector<8x32xf32>
      %59 = arith.mulf %49, %58 : vector<8x32xf32>
      %60 = tpu.iota {dimensions = array<i32: 0>} : vector<8x8xi32>
      %c0_28 = arith.constant 0 : index
      %c0_29 = arith.constant 0 : index
      %61 = vector.load %arg2[%c0_28, %c0_29] : memref<1x8xi32, #tpu.memory_space<vmem>>, vector<1x8xi32>
      %62 = vector.broadcast %61 : vector<1x8xi32> to vector<8x8xi32>
      %63 = arith.cmpi eq, %60, %62 : vector<8x8xi32>
      %64 = arith.extui %63 : vector<8x8xi1> to vector<8x8xi32>
      %65 = arith.sitofp %64 : vector<8x8xi32> to vector<8x8xf32>
      %cst_30 = arith.constant dense<0.000000e+00> : vector<8xf32>
      %66 = vector.multi_reduction <add>, %65, %cst_30 [1] : vector<8x8xf32> to vector<8xf32>
      %67 = vector.shape_cast %66 : vector<8xf32> to vector<8x1xf32>
      %68 = vector.broadcast %67 : vector<8x1xf32> to vector<8x32xf32>
      %69 = arith.mulf %59, %68 : vector<8x32xf32>
      %cst_31 = arith.constant dense<0.000000e+00> : vector<32xf32>
      %70 = vector.multi_reduction <add>, %69, %cst_31 [0] : vector<8x32xf32> to vector<32xf32>
      %71 = vector.shape_cast %70 : vector<32xf32> to vector<1x32xf32>
      %72 = vector.broadcast %71 : vector<1x32xf32> to vector<8x32xf32>
      %73 = arith.mulf %59, %72 : vector<8x32xf32>
      %cst_32 = arith.constant dense<0.000000e+00> : vector<8xf32>
      %74 = vector.multi_reduction <add>, %73, %cst_32 [1] : vector<8x32xf32> to vector<8xf32>
      %75 = vector.shape_cast %74 : vector<8xf32> to vector<8x1xf32>
      %cst_33 = arith.constant 2.000000e+00 : f32
      %76 = vector.broadcast %cst_33 : f32 to vector<8x1xf32>
      %77 = arith.mulf %76, %67 : vector<8x1xf32>
      %cst_34 = arith.constant 8.000000e+00 : f32
      %78 = vector.broadcast %cst_34 : f32 to vector<8x1xf32>
      %79 = arith.subf %78, %77 : vector<8x1xf32>
      %80 = arith.addf %75, %79 : vector<8x1xf32>
      %c0_35 = arith.constant 0 : index
      %c0_36 = arith.constant 0 : index
      %81 = vector.load %arg7[%c0_35, %c0_36] : memref<8x1xf32, #tpu.memory_space<vmem>>, vector<8x1xf32>
      tpu.vector_store %arg7[%c0_35, %c0_36], %80 {strides = array<i32>} : memref<8x1xf32, #tpu.memory_space<vmem>>, vector<8x1xf32>,
    } else {
    }
    %c0 = arith.constant 0 : index
    %c0_1 = arith.constant 0 : index
    %3 = vector.load %arg4[%c0, %c0_1] : memref<8x32xf32, #tpu.memory_space<vmem>>, vector<8x32xf32>
    %c0_2 = arith.constant 0 : index
    %c0_3 = arith.constant 0 : index
    %4 = vector.load %arg3[%c0_2, %c0_3] : memref<8x1xi32, #tpu.memory_space<vmem>>, vector<8x1xi32>
    %5 = tpu.iota {dimensions = array<i32: 1>} : vector<8x8xi32>
    %6 = vector.broadcast %4 : vector<8x1xi32> to vector<8x8xi32>
    %7 = arith.cmpi eq, %5, %6 : vector<8x8xi32>
    %8 = arith.extui %7 : vector<8x8xi1> to vector<8x8xi32>
    %9 = arith.sitofp %8 : vector<8x8xi32> to vector<8x8xf32>
    %c0_4 = arith.constant 0 : index
    %c0_5 = arith.constant 0 : index
    %10 = vector.load %arg5[%c0_4, %c0_5] : memref<8x32xf32, #tpu.memory_space<vmem>>, vector<8x32xf32>
    %cst = arith.constant dense<0.000000e+00> : vector<8x32xf32>
    %11 = tpu.matmul %9, %10, %cst {dimension_numbers = #tpu.dot_dimension_numbers<[1], [0], [0], [1], [0, 0, 1, 1], [], []>} : vector<8x8xf32>, vector<8x32xf32>, vector<8x32xf32> -> vector<8x32xf32>
    %12 = arith.subf %3, %11 : vector<8x32xf32>
    %13 = arith.mulf %12, %12 : vector<8x32xf32>
    %cst_6 = arith.constant dense<0.000000e+00> : vector<8xf32>
    %14 = vector.multi_reduction <add>, %13, %cst_6 [1] : vector<8x32xf32> to vector<8xf32>
    %15 = vector.shape_cast %14 : vector<8xf32> to vector<8x1xf32>
    %c0_7 = arith.constant 0 : index
    %c0_8 = arith.constant 0 : index
    %16 = vector.load %arg7[%c0_7, %c0_8] : memref<8x1xf32, #tpu.memory_space<vmem>>, vector<8x1xf32>
    %cst_9 = arith.constant dense<0.000000e+00> : vector<8x1xf32>
    %17 = tpu.matmul %9, %16, %cst_9 {dimension_numbers = #tpu.dot_dimension_numbers<[1], [0], [0], [1], [0, 0, 1, 1], [], []>} : vector<8x8xf32>, vector<8x1xf32>, vector<8x1xf32> -> vector<8x1xf32>
    %c1_i32 = arith.constant 1 : i32
    %18 = arith.muli %arg0, %c1_i32 : i32
    %19 = arith.addi %18, %arg1 : i32
    %c8_i32 = arith.constant 8 : i32
    %20 = arith.muli %19, %c8_i32 : i32
    %21 = tpu.iota {dimensions = array<i32: 0>} : vector<8x1xi32>
    %22 = vector.broadcast %20 : i32 to vector<8x1xi32>
    %23 = arith.addi %21, %22 : vector<8x1xi32>
    %c4_i32 = arith.constant 4 : i32
    %24 = vector.broadcast %c4_i32 : i32 to vector<8x1xi32>
    %25 = arith.cmpi slt, %23, %24 : vector<8x1xi32>
    %cst_10 = arith.constant 0.000000e+00 : f32
    %26 = vector.broadcast %cst_10 : f32 to vector<8x1xf32>
    %27 = arith.select %25, %15, %26 : vector<8x1xi1>, vector<8x1xf32>
    %cst_11 = arith.constant 0.000000e+00 : f32
    %28 = vector.broadcast %cst_11 : f32 to vector<8x1xf32>
    %29 = arith.select %25, %17, %28 : vector<8x1xi1>, vector<8x1xf32>
    %c0_12 = arith.constant 0 : index
    %30 = memref.load %arg8[%c0_12] : memref<2xf32, #tpu.memory_space<smem>>
    %31 = vector.shape_cast %27 : vector<8x1xf32> to vector<1x8x1xf32>
    %cst_13 = arith.constant dense<0.000000e+00> : vector<1xf32>
    %32 = vector.multi_reduction <add>, %31, %cst_13 [1, 2] : vector<1x8x1xf32> to vector<1xf32>
    %33 = vector.shape_cast %32 : vector<1xf32> to vector<1x1x1xf32>
    %34 = vector.extract %33[0, 0, 0] : f32 from vector<1x1x1xf32>
    %35 = arith.addf %30, %34 : f32
    %c0_14 = arith.constant 0 : index
    %36 = memref.load %arg8[%c0_14] : memref<2xf32, #tpu.memory_space<smem>>
    memref.store %35, %arg8[%c0_14] : memref<2xf32, #tpu.memory_space<smem>>
    %c1 = arith.constant 1 : index
    %37 = memref.load %arg8[%c1] : memref<2xf32, #tpu.memory_space<smem>>
    %38 = vector.shape_cast %29 : vector<8x1xf32> to vector<1x8x1xf32>
    %cst_15 = arith.constant dense<0.000000e+00> : vector<1xf32>
    %39 = vector.multi_reduction <add>, %38, %cst_15 [1, 2] : vector<1x8x1xf32> to vector<1xf32>
    %40 = vector.shape_cast %39 : vector<1xf32> to vector<1x1x1xf32>
    %41 = vector.extract %40[0, 0, 0] : f32 from vector<1x1x1xf32>
    %42 = arith.addf %37, %41 : f32
    %c1_16 = arith.constant 1 : index
    %43 = memref.load %arg8[%c1_16] : memref<2xf32, #tpu.memory_space<smem>>
    memref.store %42, %arg8[%c1_16] : memref<2xf32, #tpu.memory_space<smem>>
    %c0_i32_17 = arith.constant 0 : i32
    %44 = arith.cmpi eq, %arg1, %c0_i32_17 : i32
    %45 = arith.extui %44 : i1 to i32
    %c0_i32_18 = arith.constant 0 : i32
    %46 = arith.cmpi ne, %45, %c0_i32_18 : i32
    scf.if %46 {
      %c1_19 = arith.constant 1 : index
      %47 = memref.load %arg8[%c1_19] : memref<2xf32, #tpu.memory_space<smem>>
      %cst_20 = arith.constant 5.000000e-01 : f32
      %48 = arith.mulf %cst_20, %47 : f32
      %c0_21 = arith.constant 0 : index
      %49 = memref.load %arg8[%c0_21] : memref<2xf32, #tpu.memory_space<smem>>
      %cst_22 = arith.constant 1.250000e-01 : f32
      %50 = arith.mulf %cst_22, %49 : f32
      %51 = arith.addf %48, %50 : f32
      %52 = vector.broadcast %51 : f32 to vector<1x8x128xf32>
      %c0_23 = arith.constant 0 : index
      %c0_24 = arith.constant 0 : index
      %c0_25 = arith.constant 0 : index
      %53 = vector.load %arg6[%c0_23, %c0_24, %c0_25] : memref<1x8x128xf32, #tpu.memory_space<vmem>>, vector<1x8x128xf32>
      tpu.vector_store %arg6[%c0_23, %c0_24, %c0_25], %52 {strides = array<i32>} : memref<1x8x128xf32, #tpu.memory_space<vmem>>, vector<1x8x128xf32>,
    } else {
    }
    return
  }
  func.func @transform_0(%arg0: i32, %arg1: i32) -> (i32, i32) {
    %c0_i32 = arith.constant 0 : i32
    %c0_i32_0 = arith.constant 0 : i32
    %c0_i32_1 = arith.constant 0 : i32
    return %c0_i32, %c0_i32_0 : i32, i32
  }
  func.func @transform_1(%arg0: i32, %arg1: i32) -> (i32, i32) {
    %c1_i32 = arith.constant 1 : i32
    %0 = arith.muli %arg0, %c1_i32 : i32
    %1 = arith.addi %0, %arg1 : i32
    %c0_i32 = arith.constant 0 : i32
    %c0_i32_0 = arith.constant 0 : i32
    return %1, %c0_i32 : i32, i32
  }
  func.func @transform_2(%arg0: i32, %arg1: i32) -> (i32, i32) {
    %c1_i32 = arith.constant 1 : i32
    %0 = arith.muli %arg0, %c1_i32 : i32
    %1 = arith.addi %0, %arg1 : i32
    %c0_i32 = arith.constant 0 : i32
    %c0_i32_0 = arith.constant 0 : i32
    return %1, %c0_i32 : i32, i32
  }
  func.func @transform_3(%arg0: i32, %arg1: i32) -> (i32, i32) {
    %c0_i32 = arith.constant 0 : i32
    %c0_i32_0 = arith.constant 0 : i32
    %c0_i32_1 = arith.constant 0 : i32
    return %c0_i32, %c0_i32_0 : i32, i32
  }
  func.func @transform_4(%arg0: i32, %arg1: i32) -> (i32, i32, i32) {
    %c0_i32 = arith.constant 0 : i32
    %c0_i32_0 = arith.constant 0 : i32
    %c0_i32_1 = arith.constant 0 : i32
    return %arg0, %c0_i32, %c0_i32_0 : i32, i32, i32
  }
}

</mosaic_0001>

<bundles_post_ra>
// kernel: tpu_custom_call.1
= control target key start
LH: loop header
LB: loop body
LE: loop exit
PB: predicated region body
PF: predicated region fallthrough
CT: control target
= control target key end

     0   :  { %9 = vsyncpa [#allocation5], 0  ;;  %s487_s0 = inlined_call_operand.vmem [shape: s32[1,8], index: 0, kind: input, shape index: {}]   ;;  %s488_s1 = inlined_call_operand.vmem [shape: s32[8,1], index: 1, kind: input, shape index: {}]   ;;  %s489_s2 = inlined_call_operand.vmem [shape: f32[8,32], index: 2, kind: input, shape index: {}]   ;;  %s490_s3 = inlined_call_operand.hbm [shape: f32[8,32], index: 3, kind: input, shape index: {}]   ;;  %s491_s4 = inlined_call_operand.hbm [shape: f32[1,8,128], index: 4, kind: output, shape index: {}]  }
   0x1   :  { %10 = vsyncpa [#allocation6], 0  ;;  %s428_s15 = smov [#allocation4]  }
   0x2   :  { %s35_s16 = sshll.u32 %s428_s15, 4  ;;  %s36_s16 = int_to_ptr.vmem [resolvable:$true] %s35_s16 }
   0x3   :  { %s392_s17 = scalar_lea.vmem %s36_s16, 128  ;;  %p397_p1 = scmp.lt.s32.totalorder %s36_s16, %s36_s16 }
   0x4   :  { %p393_p0 = scmp.ne.s32.totalorder %s36_s16, %s392_s17  ;;  %p398_p2 = scmp.lt.s32.totalorder %s392_s17, %s392_s17 }
   0x6   :  { %p399_p3 = por %p398_p2, %p397_p1 }
   0x8   :  { %p400_p4 = pnand %p399_p3, %p393_p0 }
   0xa   :  { %403 = shalt.err (!%p400_p4)
}
   0xb   :  { %38 = dma.hbm_to_vmem [thread:$0]  %s490_s3, 128, %s36_s16, [#allocation5]  }
   0xc   :  { %424 = dma.done.wait [#allocation5], 128  }
   0xd   :  { %425 = vsyncadd [#allocation5], 4294967168  ;;  %v82_v0 = vlaneseq  ;;  %v429_v1 = vmov 0.0   ;;  %v430_v2 = vmov 0   ;;  %v72_v4 = vld [vmem:[#allocation4] sm:$0xff]  ;;  %vm74_vm0 = vcmask 261120  }
   0xe   :  { %361 = vmatprep.subr.mxu0 %v429_v1  ;;  %366 = vmatprep.subr.mxu1 %v429_v1  ;;  %v350_v5 = vld [vmem:[%s487_s0] ss:$0 sm:$0xff]  ;;  %v73_v7 = vmul.f32 %v72_v4, %v72_v4  ;;  %vm92_vm2 = vcmask 64512   ;;  %vm431_vm3 = vmmov 0   ;;  %vm111_vm6 = vcmask 7168   ;;  %s432_s26 = smov [#allocation7]  }
   0xf   :  { %380 = vset.pattern.permute.xlu1 %v430_v2  ;;  %381 = vset.pattern.permute.xlu0 %v430_v2  ;;  %v461_v3 = vshrl.u32 %v82_v0, 7  ;;  %v114_v6 = vld [vmem:[%s488_s1] sm:$0xff]  ;;  %v116_v11 = vand.u32 127, %v82_v0  ;;  %s329_s27 = sshll.u32 %s432_s26, 4  ;;  %s330_s27 = int_to_ptr.vmem [resolvable:$true] %s329_s27 }
  0x10   :  { %118 = vperm.xlu1 %380, %v114_v6   ;;  %362 = vmatpush3.msra.mxu0 %v72_v4  ;;  %v75_v9 = vsel %vm74_vm0, %v73_v7, 0.0  ;;  %v113_v33 = vld [vmem:[%s489_s2] sm:$0xff]  ;;  %s404_s29 = scalar_lea.vmem %s330_s27, 128  ;;  %p409_p6 = scmp.lt.s32.totalorder %s330_s27, %s330_s27 }
  0x11   :  { %vm89_vm1 = vcmp.eq.s32.totalorder %v461_v3, %v350_v5  ;;  %76 = vadd.xlane.f32.xlu0 %v75_v9  ;;  %363 = vmatprep.mubr.msk.f32.mxu0 %vm431_vm3, %v429_v1  ;;  %vm281_vm7 = vcmp.lt.s32.totalorder %v461_v3, 4  ;;  %p405_p5 = scmp.ne.s32.totalorder %s330_s27, %s404_s29  ;;  %p410_p7 = scmp.lt.s32.totalorder %s404_s29, %s404_s29 }
  0x12   :  { %v351_v8 = vsel %vm89_vm1, 1.0, %v429_v1  ;;  %368 = vmatprep.mubr.msk.f32.mxu1 %vm431_vm3, %v429_v1 }
  0x13   :  { %v93_v10 = vsel %vm92_vm2, %v351_v8, 0.0  ;;  %p411_p8 = por %p410_p7, %p409_p6 }
  0x15   :  { %94 = vadd.xlane.f32.xlu0 %v93_v10  ;;  %p412_p9 = pnand %p411_p8, %p405_p5 }
  0x8b   :  { %v119_v12 = vpop.permute.xlu1 %118 }
  0x8c   :  { %vm120_vm4 = vcmp.eq.s32.totalorder %v116_v11, %v119_v12 }
  0x8d   :  { %v352_v13 = vsel %vm120_vm4, 1.0, %v429_v1 }
  0x8e   :  { %364 = vmatmul.mubr.msk.f32.vlgmr.msra.gmra.mxu0 %vm92_vm2, %v352_v13 }
  0x9a   :  { %v77_v14 = vpop.xlane.xlu0 %76 }
  0x9b   :  { %382 = vrsqrt.f32 %v77_v14  ;;  %vm78_vm5 = vcmp.gt.f32.partialorder %v77_v14, 0.0 }
  0x9e   :  { %v95_v17 = vpop.xlane.xlu0 %94 }
  0x9f   :  { %v108_v29 = vmul.f32 2.0, %v95_v17 }
  0xa1   :  { %v109_v30 = vsub.f32 8.0, %v108_v29 }
  0xa8   :  { %v383_v15 = vpop.eup %382 }
  0xa9   :  { %v80_v16 = vsel %vm78_vm5, %v383_v15, 0.0 }
  0xaa   :  { %v81_v18 = vmul.f32 %v80_v16, %v72_v4 }
  0xac   :  { %v96_v19 = vmul.f32 %v95_v17, %v81_v18 }
  0xae   :  { %v97_v20 = vsel %vm74_vm0, %v96_v19, 0.0 }
  0xaf   :  { %v98_v21 = vrot.slane %v97_v20, 4 }
  0xb1   :  { %v99_v22 = vadd.f32 %v98_v21, %v97_v20 }
  0xb3   :  { %v100_v23 = vrot.slane %v99_v22, 2 }
  0xb5   :  { %v101_v24 = vadd.f32 %v100_v23, %v99_v22 }
  0xb7   :  { %v102_v25 = vrot.slane %v101_v24, 1 }
  0xb9   :  { %v103_v26 = vadd.f32 %v102_v25, %v101_v24 }
  0xbb   :  { %v104_v27 = vmul.f32 %v103_v26, %v81_v18 }
  0xbd   :  { %v105_v28 = vsel %vm74_vm0, %v104_v27, 0.0 }
  0xbe   :  { %106 = vadd.xlane.f32.xlu1 %v105_v28 }
 0x147   :  { %v107_v31 = vpop.xlane.xlu1 %106 }
 0x148   :  { %v110_v32 = vadd.f32 %v109_v30, %v107_v31 }
 0x14a   :  { %112 = vst.msk [vmem:[#allocation2] sm:$0xff] %vm111_vm6, %v110_v32 }
 0x14e   :  { %v194_v34 = vpop.f32.mrf.mxu0 }
 0x14f   :  { %v198_v35 = vsub.f32 %v113_v33, %v194_v34 }
 0x150   :  { %v365_v36 = vpop.f32.mrf.mxu0 }
 0x151   :  { %v199_v37 = vmul.f32 %v198_v35, %v198_v35  ;;  %v204_v38 = vld [vmem:[#allocation2] sm:$0xff] }
 0x152   :  { %367 = vmatpush3.msra.mxu1 %v204_v38 }
 0x153   :  { %v201_v39 = vsel %vm74_vm0, %v199_v37, 0.0  ;;  %369 = vmatmul.mubr.msk.f32.vlgmr.msra.gmra.mxu1 %vm92_vm2, %v352_v13 }
 0x154   :  { %202 = vadd.xlane.f32.xlu0 %v201_v39 }
 0x1dd   :  { %v203_v40 = vpop.xlane.xlu0 %202 }
 0x1de   :  { %v282_v41 = vsel %vm281_vm7, %v203_v40, 0.0 }
 0x1df   :  { %v286_v42 = vsel %vm111_vm6, %v282_v41, 0.0 }
 0x1e0   :  { %287 = vadd.xlane.f32.xlu0 %v286_v42 }
 0x213   :  { %v271_v43 = vpop.f32.mrf.mxu1 }
 0x214   :  { %v283_v44 = vsel %vm281_vm7, %v271_v43, 0.0 }
 0x215   :  { %v370_v45 = vpop.f32.mrf.mxu1  ;;  %v300_v46 = vsel %vm111_vm6, %v283_v44, 0.0 }
 0x216   :  { %301 = vadd.xlane.f32.xlu0 %v300_v46 }
 0x269   :  { %v288_v47 = vpop.xlane.xlu0 %287 }
 0x26a   :  { %v289_v48 = vrot.slane %v288_v47, 4 }
 0x26c   :  { %v290_v49 = vadd.f32 %v289_v48, %v288_v47 }
 0x26e   :  { %v291_v50 = vrot.slane %v290_v49, 2 }
 0x270   :  { %v292_v51 = vadd.f32 %v291_v50, %v290_v49 }
 0x272   :  { %v293_v52 = vrot.slane %v292_v51, 1 }
 0x274   :  { %v294_v53 = vadd.f32 %v293_v52, %v292_v51 }
 0x276   :  { %371 = vpush %v294_v53 }
 0x29f   :  { %v302_v54 = vpop.xlane.xlu0 %301 }
 0x2a0   :  { %v303_v55 = vrot.slane %v302_v54, 4 }
 0x2a2   :  { %v304_v56 = vadd.f32 %v303_v55, %v302_v54 }
 0x2a4   :  { %v305_v57 = vrot.slane %v304_v56, 2 }
 0x2a6   :  { %v306_v58 = vadd.f32 %v305_v57, %v304_v56 }
 0x2a7   :  { %s372_s2 = spop %371 }
 0x2a8   :  { %v307_v59 = vrot.slane %v306_v58, 1  ;;  %s319_s3 = smul.f32 0.125, %s372_s2 }
 0x2aa   :  { %v308_v60 = vadd.f32 %v307_v59, %v306_v58 }
 0x2ac   :  { %373 = vpush %v308_v60 }
 0x2dd   :  { %s374_s24 = spop %373 }
 0x2de   :  { %s317_s25 = smul.f32 0.5, %s374_s24 }
 0x2e0   :  { %s320_s28 = sadd.f32 %s319_s3, %s317_s25 }
 0x2e2   :  { %v321_v61 = vstv %s320_s28 }
 0x2e3   :  { %322 = vst [vmem:[#allocation7] sm:$0xff] %v321_v61 }
 0x2e4   :  { %415 = shalt.err (!%p412_p9)
}
 0x2e5   :  { %332 = dma.vmem_to_hbm [thread:$0]  %s330_s27, 128, %s491_s4, [#allocation6]  }
 0x2e6   :  { %426 = dma.done.wait [#allocation6], 128  }
 0x2e7   :  { %427 = vsyncadd [#allocation6], 4294967168 }
 0x2e8   :  { %336 = vsyncpa [#allocation5], 1 }
 0x2e9   :  { %337 = vsyncpa [#allocation6], 1 }

// kernel: tpu_custom_call.1
= control target key start
LH: loop header
LB: loop body
LE: loop exit
PB: predicated region body
PF: predicated region fallthrough
CT: control target
= control target key end

     0   :  { %9 = vsyncpa [#allocation5], 0  ;;  %s487_s0 = inlined_call_operand.vmem [shape: s32[1,8], index: 0, kind: input, shape index: {}]   ;;  %s488_s1 = inlined_call_operand.vmem [shape: s32[8,1], index: 1, kind: input, shape index: {}]   ;;  %s489_s2 = inlined_call_operand.vmem [shape: f32[8,32], index: 2, kind: input, shape index: {}]   ;;  %s490_s3 = inlined_call_operand.hbm [shape: f32[8,32], index: 3, kind: input, shape index: {}]   ;;  %s491_s4 = inlined_call_operand.hbm [shape: f32[1,8,128], index: 4, kind: output, shape index: {}]  }
   0x1   :  { %10 = vsyncpa [#allocation6], 0  ;;  %s428_s15 = smov [#allocation4]  }
   0x2   :  { %s35_s16 = sshll.u32 %s428_s15, 4  ;;  %s36_s16 = int_to_ptr.vmem [resolvable:$true] %s35_s16 }
   0x3   :  { %s392_s17 = scalar_lea.vmem %s36_s16, 128  ;;  %p397_p1 = scmp.lt.s32.totalorder %s36_s16, %s36_s16 }
   0x4   :  { %p393_p0 = scmp.ne.s32.totalorder %s36_s16, %s392_s17  ;;  %p398_p2 = scmp.lt.s32.totalorder %s392_s17, %s392_s17 }
   0x6   :  { %p399_p3 = por %p398_p2, %p397_p1 }
   0x8   :  { %p400_p4 = pnand %p399_p3, %p393_p0 }
   0xa   :  { %403 = shalt.err (!%p400_p4)
}
   0xb   :  { %38 = dma.hbm_to_vmem [thread:$0]  %s490_s3, 128, %s36_s16, [#allocation5]  }
   0xc   :  { %424 = dma.done.wait [#allocation5], 128  }
   0xd   :  { %425 = vsyncadd [#allocation5], 4294967168  ;;  %v82_v0 = vlaneseq  ;;  %v429_v1 = vmov 0.0   ;;  %v430_v2 = vmov 0   ;;  %v72_v4 = vld [vmem:[#allocation4] sm:$0xff]  ;;  %vm74_vm0 = vcmask 261120  }
   0xe   :  { %361 = vmatprep.subr.mxu0 %v429_v1  ;;  %366 = vmatprep.subr.mxu1 %v429_v1  ;;  %v350_v5 = vld [vmem:[%s487_s0] ss:$0 sm:$0xff]  ;;  %v73_v7 = vmul.f32 %v72_v4, %v72_v4  ;;  %vm92_vm2 = vcmask 64512   ;;  %vm431_vm3 = vmmov 0   ;;  %vm111_vm6 = vcmask 7168   ;;  %s432_s26 = smov [#allocation7]  }
   0xf   :  { %380 = vset.pattern.permute.xlu1 %v430_v2  ;;  %381 = vset.pattern.permute.xlu0 %v430_v2  ;;  %v461_v3 = vshrl.u32 %v82_v0, 7  ;;  %v114_v6 = vld [vmem:[%s488_s1] sm:$0xff]  ;;  %v116_v11 = vand.u32 127, %v82_v0  ;;  %s329_s27 = sshll.u32 %s432_s26, 4  ;;  %s330_s27 = int_to_ptr.vmem [resolvable:$true] %s329_s27 }
  0x10   :  { %118 = vperm.xlu1 %380, %v114_v6   ;;  %362 = vmatpush3.msra.mxu0 %v72_v4  ;;  %v75_v9 = vsel %vm74_vm0, %v73_v7, 0.0  ;;  %v113_v33 = vld [vmem:[%s489_s2] sm:$0xff]  ;;  %s404_s29 = scalar_lea.vmem %s330_s27, 128  ;;  %p409_p6 = scmp.lt.s32.totalorder %s330_s27, %s330_s27 }
  0x11   :  { %vm89_vm1 = vcmp.eq.s32.totalorder %v461_v3, %v350_v5  ;;  %76 = vadd.xlane.f32.xlu0 %v75_v9  ;;  %363 = vmatprep.mubr.msk.f32.mxu0 %vm431_vm3, %v429_v1  ;;  %vm281_vm7 = vcmp.lt.s32.totalorder %v461_v3, 4  ;;  %p405_p5 = scmp.ne.s32.totalorder %s330_s27, %s404_s29  ;;  %p410_p7 = scmp.lt.s32.totalorder %s404_s29, %s404_s29 }
  0x12   :  { %v351_v8 = vsel %vm89_vm1, 1.0, %v429_v1  ;;  %368 = vmatprep.mubr.msk.f32.mxu1 %vm431_vm3, %v429_v1 }
  0x13   :  { %v93_v10 = vsel %vm92_vm2, %v351_v8, 0.0  ;;  %p411_p8 = por %p410_p7, %p409_p6 }
  0x15   :  { %94 = vadd.xlane.f32.xlu0 %v93_v10  ;;  %p412_p9 = pnand %p411_p8, %p405_p5 }
  0x8b   :  { %v119_v12 = vpop.permute.xlu1 %118 }
  0x8c   :  { %vm120_vm4 = vcmp.eq.s32.totalorder %v116_v11, %v119_v12 }
  0x8d   :  { %v352_v13 = vsel %vm120_vm4, 1.0, %v429_v1 }
  0x8e   :  { %364 = vmatmul.mubr.msk.f32.vlgmr.msra.gmra.mxu0 %vm92_vm2, %v352_v13 }
  0x9a   :  { %v77_v14 = vpop.xlane.xlu0 %76 }
  0x9b   :  { %382 = vrsqrt.f32 %v77_v14  ;;  %vm78_vm5 = vcmp.gt.f32.partialorder %v77_v14, 0.0 }
  0x9e   :  { %v95_v17 = vpop.xlane.xlu0 %94 }
  0x9f   :  { %v108_v29 = vmul.f32 2.0, %v95_v17 }
  0xa1   :  { %v109_v30 = vsub.f32 8.0, %v108_v29 }
  0xa8   :  { %v383_v15 = vpop.eup %382 }
  0xa9   :  { %v80_v16 = vsel %vm78_vm5, %v383_v15, 0.0 }
  0xaa   :  { %v81_v18 = vmul.f32 %v80_v16, %v72_v4 }
  0xac   :  { %v96_v19 = vmul.f32 %v95_v17, %v81_v18 }
  0xae   :  { %v97_v20 = vsel %vm74_vm0, %v96_v19, 0.0 }
  0xaf   :  { %v98_v21 = vrot.slane %v97_v20, 4 }
  0xb1   :  { %v99_v22 = vadd.f32 %v98_v21, %v97_v20 }
  0xb3   :  { %v100_v23 = vrot.slane %v99_v22, 2 }
  0xb5   :  { %v101_v24 = vadd.f32 %v100_v23, %v99_v22 }
  0xb7   :  { %v102_v25 = vrot.slane %v101_v24, 1 }
  0xb9   :  { %v103_v26 = vadd.f32 %v102_v25, %v101_v24 }
  0xbb   :  { %v104_v27 = vmul.f32 %v103_v26, %v81_v18 }
  0xbd   :  { %v105_v28 = vsel %vm74_vm0, %v104_v27, 0.0 }
  0xbe   :  { %106 = vadd.xlane.f32.xlu1 %v105_v28 }
 0x147   :  { %v107_v31 = vpop.xlane.xlu1 %106 }
 0x148   :  { %v110_v32 = vadd.f32 %v109_v30, %v107_v31 }
 0x14a   :  { %112 = vst.msk [vmem:[#allocation2] sm:$0xff] %vm111_vm6, %v110_v32 }
 0x14e   :  { %v194_v34 = vpop.f32.mrf.mxu0 }
 0x14f   :  { %v198_v35 = vsub.f32 %v113_v33, %v194_v34 }
 0x150   :  { %v365_v36 = vpop.f32.mrf.mxu0 }
 0x151   :  { %v199_v37 = vmul.f32 %v198_v35, %v198_v35  ;;  %v204_v38 = vld [vmem:[#allocation2] sm:$0xff] }
 0x152   :  { %367 = vmatpush3.msra.mxu1 %v204_v38 }
 0x153   :  { %v201_v39 = vsel %vm74_vm0, %v199_v37, 0.0  ;;  %369 = vmatmul.mubr.msk.f32.vlgmr.msra.gmra.mxu1 %vm92_vm2, %v352_v13 }
 0x154   :  { %202 = vadd.xlane.f32.xlu0 %v201_v39 }
 0x1dd   :  { %v203_v40 = vpop.xlane.xlu0 %202 }
 0x1de   :  { %v282_v41 = vsel %vm281_vm7, %v203_v40, 0.0 }
 0x1df   :  { %v286_v42 = vsel %vm111_vm6, %v282_v41, 0.0 }
 0x1e0   :  { %287 = vadd.xlane.f32.xlu0 %v286_v42 }
 0x213   :  { %v271_v43 = vpop.f32.mrf.mxu1 }
 0x214   :  { %v283_v44 = vsel %vm281_vm7, %v271_v43, 0.0 }
 0x215   :  { %v370_v45 = vpop.f32.mrf.mxu1  ;;  %v300_v46 = vsel %vm111_vm6, %v283_v44, 0.0 }
 0x216   :  { %301 = vadd.xlane.f32.xlu0 %v300_v46 }
 0x269   :  { %v288_v47 = vpop.xlane.xlu0 %287 }
 0x26a   :  { %v289_v48 = vrot.slane %v288_v47, 4 }
 0x26c   :  { %v290_v49 = vadd.f32 %v289_v48, %v288_v47 }
 0x26e   :  { %v291_v50 = vrot.slane %v290_v49, 2 }
 0x270   :  { %v292_v51 = vadd.f32 %v291_v50, %v290_v49 }
 0x272   :  { %v293_v52 = vrot.slane %v292_v51, 1 }
 0x274   :  { %v294_v53 = vadd.f32 %v293_v52, %v292_v51 }
 0x276   :  { %371 = vpush %v294_v53 }
 0x29f   :  { %v302_v54 = vpop.xlane.xlu0 %301 }
 0x2a0   :  { %v303_v55 = vrot.slane %v302_v54, 4 }
 0x2a2   :  { %v304_v56 = vadd.f32 %v303_v55, %v302_v54 }
 0x2a4   :  { %v305_v57 = vrot.slane %v304_v56, 2 }
 0x2a6   :  { %v306_v58 = vadd.f32 %v305_v57, %v304_v56 }
 0x2a7   :  { %s372_s2 = spop %371 }
 0x2a8   :  { %v307_v59 = vrot.slane %v306_v58, 1  ;;  %s319_s3 = smul.f32 0.125, %s372_s2 }
 0x2aa   :  { %v308_v60 = vadd.f32 %v307_v59, %v306_v58 }
 0x2ac   :  { %373 = vpush %v308_v60 }
 0x2dd   :  { %s374_s24 = spop %373 }
 0x2de   :  { %s317_s25 = smul.f32 0.5, %s374_s24 }
 0x2e0   :  { %s320_s28 = sadd.f32 %s319_s3, %s317_s25 }
 0x2e2   :  { %v321_v61 = vstv %s320_s28 }
 0x2e3   :  { %322 = vst [vmem:[#allocation7] sm:$0xff] %v321_v61 }
 0x2e4   :  { %415 = shalt.err (!%p412_p9)
}
 0x2e5   :  { %332 = dma.vmem_to_hbm [thread:$0]  %s330_s27, 128, %s491_s4, [#allocation6]  }
 0x2e6   :  { %426 = dma.done.wait [#allocation6], 128  }
 0x2e7   :  { %427 = vsyncadd [#allocation6], 4294967168 }
 0x2e8   :  { %336 = vsyncpa [#allocation5], 1 }
 0x2e9   :  { %337 = vsyncpa [#allocation6], 1 }

</bundles_post_ra>
